<compile_context>
chip_gen: v7x
topology: tpu7x:2x2x1
jax: 0.10.0
libtpu: 0.0.40
codegen_flags: <defaults>
</compile_context>

<pallas_src>
import functools

import jax
import jax.numpy as jnp
from jax.experimental import pallas as pl
from jax.experimental.pallas import tpu as pltpu


def _pinn_mlp_kernel(x_ref,
                     w1_ref, b1_ref, w2_ref, b2_ref, w3_ref, b3_ref,
                     w4_ref, b4_ref, w5_ref, b5_ref, w6_ref, b6_ref,
                     out_ref, *, n_sub, n_out, act_dtype):
    """Packed-row MLP: x_ref (TM, 2P), hidden width NN*P (==128 when packed),
    out_ref (TM, P).  All weights are block-diagonal 'lane packed' versions."""
    tm = x_ref.shape[0]
    sub = tm // n_sub
    hid_refs = ((w2_ref, b2_ref), (w3_ref, b3_ref),
                (w4_ref, b4_ref), (w5_ref, b5_ref))

    # Statically unrolled, *independent* sub-tile chains: the scheduler can
    # overlap one chain's tanh (EUP) with the other chain's matmul (MXU).
    # sub is kept <= ~128 packed rows by the wrapper so each chain's live
    # activations stay around 16 vregs (no spills).
    for j in range(n_sub):
        lo = j * sub                                   # static offset
        xp = x_ref[pl.ds(lo, sub), :]                  # (sub, 2P)

        # Layer 1: lb/ub normalization already folded into w1/b1 (wrapper).
        h = jnp.dot(xp, w1_ref[...],
                    preferred_element_type=jnp.float32) + b1_ref[...]
        h = jnp.tanh(h.astype(act_dtype))

        # Hidden layers 2..5: lane-dense block-diagonal matmuls, f32 accumulate.
        for (w_ref, b_ref) in hid_refs:
            h = jnp.dot(h.astype(w_ref.dtype), w_ref[...],
                        preferred_element_type=jnp.float32) + b_ref[...]
            h = jnp.tanh(h.astype(act_dtype))

        # Output layer: block-column weights zero-padded to 128 lanes (safe,
        # MXU has slack); keep only the P real output columns.
        o = jnp.dot(h.astype(w6_ref.dtype), w6_ref[...],
                    preferred_element_type=jnp.float32)
        out_ref[pl.ds(lo, sub), :] = o[:, :n_out] + b6_ref[...]


def _round_up(a, m):
    return ((a + m - 1) // m) * m


@functools.partial(jax.jit,
                   static_argnames=("tile_rows", "interleave", "use_bf16"))
def pinn_forward(x, lb, ub, params, tile_rows=None, interleave=2,
                 use_bf16=False):
    """x: (B, 2) float32, lb/ub: (2,), params: dict of [in, out]-layout weights."""
    B = x.shape[0]
    NN = params["w1"].shape[1]
    x = x.astype(jnp.float32)

    # ---- lane-packing factor: pack P batch rows into the 128-lane vreg ------
    P = 128 // NN if (NN <= 128 and 128 % NN == 0) else 1
    width = NN * P                                   # packed hidden width

    # ---- packed-row tiling ---------------------------------------------------
    Mp = _round_up(B, P) // P                        # packed rows (pre-padding)
    Mp8 = _round_up(Mp, 8)

    if tile_rows is None:
        cap = 256          # 256 packed rows/step -> two 128-row chains (~16 vregs each)
        if Mp8 >= 16:
            # prefer >= 2 grid steps so v7x's two TensorCores both get work
            tile_rows = min(cap, _round_up((Mp8 + 1) // 2, 8))
        else:
            tile_rows = Mp8
    else:
        tile_rows = _round_up(tile_rows, 8)
    tile_rows = max(8, tile_rows)

    Mp_pad = _round_up(Mp8, tile_rows)
    padded_B = Mp_pad * P
    if padded_B != B:
        x = jnp.pad(x, ((0, padded_B - B), (0, 0)))
    # contiguous-group packing: packed row r, slot p  <->  batch row r*P + p
    xp = x.reshape(Mp_pad, 2 * P)

    # 2-way in-kernel interleave only when sub-tiles stay sublane-aligned.
    n_sub = interleave if (interleave > 1
                           and tile_rows % interleave == 0
                           and (tile_rows // interleave) % 8 == 0) else 1

    # ---- fold the [-1, 1] normalization into layer 1 (wrapper-time) ----------
    lb2 = lb.reshape(1, 2).astype(jnp.float32)
    ub2 = ub.reshape(1, 2).astype(jnp.float32)
    scale = 2.0 / (ub2 - lb2)                        # (1, 2)
    shift = -2.0 * lb2 / (ub2 - lb2) - 1.0           # (1, 2)
    w1f = params["w1"] * scale.reshape(2, 1)         # (2, NN)
    b1f = params["b1"] + shift @ params["w1"]        # (1, NN)

    # ---- block-diagonal "lane packed" weights (tiny, built once per trace) ---
    eye_p = jnp.eye(P, dtype=jnp.float32)

    def bdiag(w):
        return jnp.kron(eye_p, w)

    w1_blk = bdiag(w1f)                              # (2P, NN*P)
    b1_blk = jnp.tile(b1f, (1, P))                   # (1, NN*P)

    hid_dtype = jnp.bfloat16 if use_bf16 else jnp.float32
    w_blk, b_blk = {}, {}
    for name in ("2", "3", "4", "5"):
        w_blk[name] = bdiag(params["w" + name]).astype(hid_dtype)  # (NN*P, NN*P)
        b_blk[name] = jnp.tile(params["b" + name], (1, P))         # (1, NN*P)

    # Output layer: block-column weights, zero-padded to 128 lanes.
    w6_col = jnp.kron(eye_p, params["w6"])           # (NN*P, P)
    if P < 128:
        w6_col = jnp.pad(w6_col, ((0, 0), (0, 128 - P)))
    w6_col = w6_col.astype(jnp.float32)
    b6 = params["b6"].reshape(1, 1)

    # ---- BlockSpecs -----------------------------------------------------------
    # Weights are small here (NN=32 packed -> ~330 KB); if NN is ever scaled to
    # >=1024, single-buffer them (pipeline_mode=pl.Buffered(1)) or raise
    # vmem_limit_bytes (matters most on v7x's 64 MiB VMEM).
    def const_spec(shape):
        return pl.BlockSpec(shape, lambda i: (0, 0))

    in_specs = [
        pl.BlockSpec((tile_rows, 2 * P), lambda i: (i, 0)),   # packed x
        const_spec(w1_blk.shape), const_spec(b1_blk.shape),
        const_spec(w_blk["2"].shape), const_spec(b_blk["2"].shape),
        const_spec(w_blk["3"].shape), const_spec(b_blk["3"].shape),
        const_spec(w_blk["4"].shape), const_spec(b_blk["4"].shape),
        const_spec(w_blk["5"].shape), const_spec(b_blk["5"].shape),
        const_spec(w6_col.shape), const_spec(b6.shape),
    ]
    out_spec = pl.BlockSpec((tile_rows, P), lambda i: (i, 0))

    act_dtype = jnp.bfloat16 if use_bf16 else jnp.float32

    outp = pl.pallas_call(
        functools.partial(_pinn_mlp_kernel, n_sub=n_sub, n_out=P,
                          act_dtype=act_dtype),
        out_shape=jax.ShapeDtypeStruct((Mp_pad, P), jnp.float32),
        grid_spec=pltpu.PrefetchScalarGridSpec(
            num_scalar_prefetch=0,
            grid=(Mp_pad // tile_rows,),
            in_specs=in_specs,
            out_specs=out_spec,
        ),
        compiler_params=pltpu.CompilerParams(
            dimension_semantics=("parallel",)),
    )(xp,
      w1_blk, b1_blk,
      w_blk["2"], b_blk["2"], w_blk["3"], b_blk["3"],
      w_blk["4"], b_blk["4"], w_blk["5"], b_blk["5"],
      w6_col, b6)

    # Contiguous-group packing makes unpacking a plain row-major reshape.
    out = outp.reshape(padded_B, 1)
    return out[:B] if padded_B != B else out


def init_params(key, NN):
    """Deterministic parameter init (shapes match the PyTorch module),
    stored pre-transposed as [in_features, out_features]."""
    ks = jax.random.split(key, 12)

    def lin(kw, kb, fan_in, fan_out):
        bound = 1.0 / jnp.sqrt(fan_in)
        w = jax.random.uniform(kw, (fan_in, fan_out), jnp.float32, -bound, bound)
        b = jax.random.uniform(kb, (1, fan_out), jnp.float32, -bound, bound)
        return w, b

    p = {}
    p["w1"], p["b1"] = lin(ks[0], ks[1], 2, NN)
    p["w2"], p["b2"] = lin(ks[2], ks[3], NN, NN)
    p["w3"], p["b3"] = lin(ks[4], ks[5], NN, NN)
    p["w4"], p["b4"] = lin(ks[6], ks[7], NN, NN)
    p["w5"], p["b5"] = lin(ks[8], ks[9], NN, NN)
    p["w6"], p["b6"] = lin(ks[10], ks[11], NN, 1)
    # eb/ei/ec are trainable loss weights in the module; they do not enter forward().
    return p


def reference_forward(x, lb, ub, p):
    hp = jax.lax.Precision.HIGHEST
    x1 = 2.0 * (x - lb[None, :]) / (ub[None, :] - lb[None, :]) - 1.0
    h = jnp.tanh(jnp.dot(x1, p["w1"], precision=hp) + p["b1"])
    for n in ("2", "3", "4", "5"):
        h = jnp.tanh(jnp.dot(h, p["w" + n], precision=hp) + p["b" + n])
    return jnp.dot(h, p["w6"], precision=hp) + p["b6"]


if __name__ == "__main__":
    key = jax.random.PRNGKey(0)
    k_param, k_x = jax.random.split(key)

    NN = 32          # hidden width
    B = 64           # batch of collocation points (x, t)

    params = init_params(k_param, NN)

    # Allen-Cahn domain bounds: x in [-1, 1], t in [0, 1]
    lb = jnp.array([-1.0, 0.0], dtype=jnp.float32)
    ub = jnp.array([1.0, 1.0], dtype=jnp.float32)

    # Sample points inside [lb, ub]
    u = jax.random.uniform(k_x, (B, 2), jnp.float32)
    x = lb[None, :] + u * (ub - lb)[None, :]

    out = pinn_forward(x, lb, ub, params)       # f32 path (default)
    out = jax.block_until_ready(out)

    ref = reference_forward(x, lb, ub, params)
    assert out.shape == (B, 1)
    err = float(jnp.max(jnp.abs(out - ref)))
    assert jnp.allclose(out, ref, atol=2e-5, rtol=2e-5), err

    print("KERNEL_OK")
</pallas_src>

<mosaic_0001>
module attributes {stable_mosaic.version = 11 : i64} {
  func.func @_pinn_mlp_kernel(%arg0: i32, %arg1: memref<8x8xf32, #tpu.memory_space<vmem>>, %arg2: memref<8x128xf32, #tpu.memory_space<vmem>>, %arg3: memref<1x128xf32, #tpu.memory_space<vmem>>, %arg4: memref<128x128xf32, #tpu.memory_space<vmem>>, %arg5: memref<1x128xf32, #tpu.memory_space<vmem>>, %arg6: memref<128x128xf32, #tpu.memory_space<vmem>>, %arg7: memref<1x128xf32, #tpu.memory_space<vmem>>, %arg8: memref<128x128xf32, #tpu.memory_space<vmem>>, %arg9: memref<1x128xf32, #tpu.memory_space<vmem>>, %arg10: memref<128x128xf32, #tpu.memory_space<vmem>>, %arg11: memref<1x128xf32, #tpu.memory_space<vmem>>, %arg12: memref<128x128xf32, #tpu.memory_space<vmem>>, %arg13: memref<1x1xf32, #tpu.memory_space<vmem>>, %arg14: memref<8x4xf32, #tpu.memory_space<vmem>>) attributes {dimension_semantics = [#tpu.dimension_semantics<parallel>], iteration_bounds = array<i64: 2>, scalar_prefetch = 0 : i64, scratch_operands = 0 : i64, tpu.core_type = #tpu.core_type<tc>, window_params = [{transform_indices = @transform_0, window_bounds = array<i64: 8, 8>}, {pipeline_mode = #tpu.pipeline_mode<synchronous>, transform_indices = @transform_1, window_bounds = array<i64: 8, 128>}, {pipeline_mode = #tpu.pipeline_mode<synchronous>, transform_indices = @transform_2, window_bounds = array<i64: 1, 128>}, {pipeline_mode = #tpu.pipeline_mode<synchronous>, transform_indices = @transform_3, window_bounds = array<i64: 128, 128>}, {pipeline_mode = #tpu.pipeline_mode<synchronous>, transform_indices = @transform_4, window_bounds = array<i64: 1, 128>}, {pipeline_mode = #tpu.pipeline_mode<synchronous>, transform_indices = @transform_5, window_bounds = array<i64: 128, 128>}, {pipeline_mode = #tpu.pipeline_mode<synchronous>, transform_indices = @transform_6, window_bounds = array<i64: 1, 128>}, {pipeline_mode = #tpu.pipeline_mode<synchronous>, transform_indices = @transform_7, window_bounds = array<i64: 128, 128>}, {pipeline_mode = #tpu.pipeline_mode<synchronous>, transform_indices = @transform_8, window_bounds = array<i64: 1, 128>}, {pipeline_mode = #tpu.pipeline_mode<synchronous>, transform_indices = @transform_9, window_bounds = array<i64: 128, 128>}, {pipeline_mode = #tpu.pipeline_mode<synchronous>, transform_indices = @transform_10, window_bounds = array<i64: 1, 128>}, {pipeline_mode = #tpu.pipeline_mode<synchronous>, transform_indices = @transform_11, window_bounds = array<i64: 128, 128>}, {pipeline_mode = #tpu.pipeline_mode<synchronous>, transform_indices = @transform_12, window_bounds = array<i64: 1, 1>}, {transform_indices = @transform_13, window_bounds = array<i64: 8, 4>}]} {
    %c0 = arith.constant 0 : index
    %c0_0 = arith.constant 0 : index
    %0 = vector.load %arg1[%c0, %c0_0] : memref<8x8xf32, #tpu.memory_space<vmem>>, vector<8x8xf32>
    %c0_1 = arith.constant 0 : index
    %c0_2 = arith.constant 0 : index
    %1 = vector.load %arg2[%c0_1, %c0_2] : memref<8x128xf32, #tpu.memory_space<vmem>>, vector<8x128xf32>
    %cst = arith.constant dense<0.000000e+00> : vector<8x128xf32>
    %2 = tpu.matmul %0, %1, %cst {dimension_numbers = #tpu.dot_dimension_numbers<[1], [0], [0], [1], [0, 0, 1, 1], [], []>} : vector<8x8xf32>, vector<8x128xf32>, vector<8x128xf32> -> vector<8x128xf32>
    %c0_3 = arith.constant 0 : index
    %c0_4 = arith.constant 0 : index
    %3 = vector.load %arg3[%c0_3, %c0_4] : memref<1x128xf32, #tpu.memory_space<vmem>>, vector<1x128xf32>
    %4 = vector.broadcast %3 : vector<1x128xf32> to vector<8x128xf32>
    %5 = arith.addf %2, %4 : vector<8x128xf32>
    %6 = math.tanh %5 : vector<8x128xf32>
    %c0_5 = arith.constant 0 : index
    %c0_6 = arith.constant 0 : index
    %7 = vector.load %arg4[%c0_5, %c0_6] : memref<128x128xf32, #tpu.memory_space<vmem>>, vector<128x128xf32>
    %cst_7 = arith.constant dense<0.000000e+00> : vector<8x128xf32>
    %8 = tpu.matmul %6, %7, %cst_7 {dimension_numbers = #tpu.dot_dimension_numbers<[1], [0], [0], [1], [0, 0, 1, 1], [], []>} : vector<8x128xf32>, vector<128x128xf32>, vector<8x128xf32> -> vector<8x128xf32>
    %c0_8 = arith.constant 0 : index
    %c0_9 = arith.constant 0 : index
    %9 = vector.load %arg5[%c0_8, %c0_9] : memref<1x128xf32, #tpu.memory_space<vmem>>, vector<1x128xf32>
    %10 = vector.broadcast %9 : vector<1x128xf32> to vector<8x128xf32>
    %11 = arith.addf %8, %10 : vector<8x128xf32>
    %12 = math.tanh %11 : vector<8x128xf32>
    %c0_10 = arith.constant 0 : index
    %c0_11 = arith.constant 0 : index
    %13 = vector.load %arg6[%c0_10, %c0_11] : memref<128x128xf32, #tpu.memory_space<vmem>>, vector<128x128xf32>
    %cst_12 = arith.constant dense<0.000000e+00> : vector<8x128xf32>
    %14 = tpu.matmul %12, %13, %cst_12 {dimension_numbers = #tpu.dot_dimension_numbers<[1], [0], [0], [1], [0, 0, 1, 1], [], []>} : vector<8x128xf32>, vector<128x128xf32>, vector<8x128xf32> -> vector<8x128xf32>
    %c0_13 = arith.constant 0 : index
    %c0_14 = arith.constant 0 : index
    %15 = vector.load %arg7[%c0_13, %c0_14] : memref<1x128xf32, #tpu.memory_space<vmem>>, vector<1x128xf32>
    %16 = vector.broadcast %15 : vector<1x128xf32> to vector<8x128xf32>
    %17 = arith.addf %14, %16 : vector<8x128xf32>
    %18 = math.tanh %17 : vector<8x128xf32>
    %c0_15 = arith.constant 0 : index
    %c0_16 = arith.constant 0 : index
    %19 = vector.load %arg8[%c0_15, %c0_16] : memref<128x128xf32, #tpu.memory_space<vmem>>, vector<128x128xf32>
    %cst_17 = arith.constant dense<0.000000e+00> : vector<8x128xf32>
    %20 = tpu.matmul %18, %19, %cst_17 {dimension_numbers = #tpu.dot_dimension_numbers<[1], [0], [0], [1], [0, 0, 1, 1], [], []>} : vector<8x128xf32>, vector<128x128xf32>, vector<8x128xf32> -> vector<8x128xf32>
    %c0_18 = arith.constant 0 : index
    %c0_19 = arith.constant 0 : index
    %21 = vector.load %arg9[%c0_18, %c0_19] : memref<1x128xf32, #tpu.memory_space<vmem>>, vector<1x128xf32>
    %22 = vector.broadcast %21 : vector<1x128xf32> to vector<8x128xf32>
    %23 = arith.addf %20, %22 : vector<8x128xf32>
    %24 = math.tanh %23 : vector<8x128xf32>
    %c0_20 = arith.constant 0 : index
    %c0_21 = arith.constant 0 : index
    %25 = vector.load %arg10[%c0_20, %c0_21] : memref<128x128xf32, #tpu.memory_space<vmem>>, vector<128x128xf32>
    %cst_22 = arith.constant dense<0.000000e+00> : vector<8x128xf32>
    %26 = tpu.matmul %24, %25, %cst_22 {dimension_numbers = #tpu.dot_dimension_numbers<[1], [0], [0], [1], [0, 0, 1, 1], [], []>} : vector<8x128xf32>, vector<128x128xf32>, vector<8x128xf32> -> vector<8x128xf32>
    %c0_23 = arith.constant 0 : index
    %c0_24 = arith.constant 0 : index
    %27 = vector.load %arg11[%c0_23, %c0_24] : memref<1x128xf32, #tpu.memory_space<vmem>>, vector<1x128xf32>
    %28 = vector.broadcast %27 : vector<1x128xf32> to vector<8x128xf32>
    %29 = arith.addf %26, %28 : vector<8x128xf32>
    %30 = math.tanh %29 : vector<8x128xf32>
    %c0_25 = arith.constant 0 : index
    %c0_26 = arith.constant 0 : index
    %31 = vector.load %arg12[%c0_25, %c0_26] : memref<128x128xf32, #tpu.memory_space<vmem>>, vector<128x128xf32>
    %cst_27 = arith.constant dense<0.000000e+00> : vector<8x128xf32>
    %32 = tpu.matmul %30, %31, %cst_27 {dimension_numbers = #tpu.dot_dimension_numbers<[1], [0], [0], [1], [0, 0, 1, 1], [], []>} : vector<8x128xf32>, vector<128x128xf32>, vector<8x128xf32> -> vector<8x128xf32>
    %33 = vector.extract_strided_slice %32 {offsets = [0, 0], sizes = [8, 4], strides = [1, 1]} : vector<8x128xf32> to vector<8x4xf32>
    %c0_28 = arith.constant 0 : index
    %c0_29 = arith.constant 0 : index
    %34 = vector.load %arg13[%c0_28, %c0_29] : memref<1x1xf32, #tpu.memory_space<vmem>>, vector<1x1xf32>
    %35 = vector.broadcast %34 : vector<1x1xf32> to vector<8x4xf32>
    %36 = arith.addf %33, %35 : vector<8x4xf32>
    %c0_30 = arith.constant 0 : index
    %c0_31 = arith.constant 0 : index
    %37 = vector.load %arg14[%c0_30, %c0_31] : memref<8x4xf32, #tpu.memory_space<vmem>>, vector<8x4xf32>
    tpu.vector_store %arg14[%c0_30, %c0_31], %36 {strides = array<i32>} : memref<8x4xf32, #tpu.memory_space<vmem>>, vector<8x4xf32>,
    return
  }
  func.func @transform_0(%arg0: i32) -> (i32, i32) {
    %c0_i32 = arith.constant 0 : i32
    %c0_i32_0 = arith.constant 0 : i32
    return %arg0, %c0_i32 : i32, i32
  }
  func.func @transform_1(%arg0: i32) -> (i32, i32) {
    %c0_i32 = arith.constant 0 : i32
    %c0_i32_0 = arith.constant 0 : i32
    %c0_i32_1 = arith.constant 0 : i32
    return %c0_i32, %c0_i32_0 : i32, i32
  }
  func.func @transform_2(%arg0: i32) -> (i32, i32) {
    %c0_i32 = arith.constant 0 : i32
    %c0_i32_0 = arith.constant 0 : i32
    %c0_i32_1 = arith.constant 0 : i32
    return %c0_i32, %c0_i32_0 : i32, i32
  }
  func.func @transform_3(%arg0: i32) -> (i32, i32) {
    %c0_i32 = arith.constant 0 : i32
    %c0_i32_0 = arith.constant 0 : i32
    %c0_i32_1 = arith.constant 0 : i32
    return %c0_i32, %c0_i32_0 : i32, i32
  }
  func.func @transform_4(%arg0: i32) -> (i32, i32) {
    %c0_i32 = arith.constant 0 : i32
    %c0_i32_0 = arith.constant 0 : i32
    %c0_i32_1 = arith.constant 0 : i32
    return %c0_i32, %c0_i32_0 : i32, i32
  }
  func.func @transform_5(%arg0: i32) -> (i32, i32) {
    %c0_i32 = arith.constant 0 : i32
    %c0_i32_0 = arith.constant 0 : i32
    %c0_i32_1 = arith.constant 0 : i32
    return %c0_i32, %c0_i32_0 : i32, i32
  }
  func.func @transform_6(%arg0: i32) -> (i32, i32) {
    %c0_i32 = arith.constant 0 : i32
    %c0_i32_0 = arith.constant 0 : i32
    %c0_i32_1 = arith.constant 0 : i32
    return %c0_i32, %c0_i32_0 : i32, i32
  }
  func.func @transform_7(%arg0: i32) -> (i32, i32) {
    %c0_i32 = arith.constant 0 : i32
    %c0_i32_0 = arith.constant 0 : i32
    %c0_i32_1 = arith.constant 0 : i32
    return %c0_i32, %c0_i32_0 : i32, i32
  }
  func.func @transform_8(%arg0: i32) -> (i32, i32) {
    %c0_i32 = arith.constant 0 : i32
    %c0_i32_0 = arith.constant 0 : i32
    %c0_i32_1 = arith.constant 0 : i32
    return %c0_i32, %c0_i32_0 : i32, i32
  }
  func.func @transform_9(%arg0: i32) -> (i32, i32) {
    %c0_i32 = arith.constant 0 : i32
    %c0_i32_0 = arith.constant 0 : i32
    %c0_i32_1 = arith.constant 0 : i32
    return %c0_i32, %c0_i32_0 : i32, i32
  }
  func.func @transform_10(%arg0: i32) -> (i32, i32) {
    %c0_i32 = arith.constant 0 : i32
    %c0_i32_0 = arith.constant 0 : i32
    %c0_i32_1 = arith.constant 0 : i32
    return %c0_i32, %c0_i32_0 : i32, i32
  }
  func.func @transform_11(%arg0: i32) -> (i32, i32) {
    %c0_i32 = arith.constant 0 : i32
    %c0_i32_0 = arith.constant 0 : i32
    %c0_i32_1 = arith.constant 0 : i32
    return %c0_i32, %c0_i32_0 : i32, i32
  }
  func.func @transform_12(%arg0: i32) -> (i32, i32) {
    %c0_i32 = arith.constant 0 : i32
    %c0_i32_0 = arith.constant 0 : i32
    %c0_i32_1 = arith.constant 0 : i32
    return %c0_i32, %c0_i32_0 : i32, i32
  }
  func.func @transform_13(%arg0: i32) -> (i32, i32) {
    %c0_i32 = arith.constant 0 : i32
    %c0_i32_0 = arith.constant 0 : i32
    return %arg0, %c0_i32 : i32, i32
  }
}

</mosaic_0001>

<bundles_post_ra>
// kernel: pinn_forward.1
= control target key start
LH: loop header
LB: loop body
LE: loop exit
PB: predicated region body
PF: predicated region fallthrough
CT: control target
= control target key end

     0   :  { %s1561_s27 = smov 0   ;;  %s1896_s0 = inlined_call_operand.vmem [shape: f32[16,8], index: 0, kind: input, shape index: {}]   ;;  %s1897_s1 = inlined_call_operand.vmem [shape: f32[8,128], index: 1, kind: input, shape index: {}]   ;;  %s1898_s2 = inlined_call_operand.vmem [shape: f32[1,128], index: 2, kind: input, shape index: {}]   ;;  %s1899_s3 = inlined_call_operand.vmem [shape: f32[128,128], index: 3, kind: input, shape index: {}]   ;;  %s1900_s4 = inlined_call_operand.vmem [shape: f32[1,128], index: 4, kind: input, shape index: {}]   ;;  %s1901_s5 = inlined_call_operand.vmem [shape: f32[128,128], index: 5, kind: input, shape index: {}]   ;;  %s1902_s6 = inlined_call_operand.vmem [shape: f32[1,128], index: 6, kind: input, shape index: {}]   ;;  %s1903_s7 = inlined_call_operand.vmem [shape: f32[128,128], index: 7, kind: input, shape index: {}]   ;;  %s1904_s8 = inlined_call_operand.vmem [shape: f32[1,128], index: 8, kind: input, shape index: {}]   ;;  %s1905_s9 = inlined_call_operand.vmem [shape: f32[128,128], index: 9, kind: input, shape index: {}]   ;;  %s1906_s10 = inlined_call_operand.vmem [shape: f32[1,128], index: 10, kind: input, shape index: {}]   ;;  %s1907_s11 = inlined_call_operand.vmem [shape: f32[128,128], index: 11, kind: input, shape index: {}]   ;;  %s1908_s12 = inlined_call_operand.<no memory space> [shape: f32[1,1], index: 12, kind: input, shape index: {}]   ;;  %s1909_s13 = inlined_call_operand.vmem [shape: f32[16,4], index: 13, kind: output, shape index: {}]  }
   0x1   :  { %v18_v0 = vstv %s1908_s12 }
   0x2   :  { %19 = vst [vmem:[#allocation2] sm:$0x1] %v18_v0 }
   0x3 LB: > { %s1050_s28 = sadd.s32 4294967295, %s1482_s27   ;;  %p1054_p0 = scmp.ge.s32.totalorder %s1482_s27, 1  ;;  %s1482_s27 = sphi %s1561_s27, %s25_s27  }
   0x4   : > { %p388_p1 = scmp.lt.s32.totalorder %s1482_s27, 3 }
   0x6   : > { %p389_p2 = pnand %p1054_p0, %p388_p1 }
   0x7   : > { %v439_v1 = vld [vmem:[%s1897_s1] sm:$0xff] (!%p389_p2)  ;;  %p430_p3 = scmp.lt.s32.totalorder (!%p389_p2), %s1050_s28, 1  ;;  %v1484_v2 = vmov (!%p389_p2), 0.0   ;;  %vm1485_vm0 = vmmov (!%p389_p2), 0   ;;  %v523_v4 = vld [vmem:[%s1899_s3 + $0x8] sm:$0xff] (!%p389_p2)  ;;  %v524_v5 = vld [vmem:[%s1899_s3 + $0x10] sm:$0xff] (!%p389_p2) }
   0x8   : > { %392 = sbr.rel (%p389_p2) target bundleno = 1359 (0x54f), region = 72  ;;  %1153 = vmatprep.subr.mxu0 (!%p389_p2), %v1484_v2  ;;  %1155 = vmatprep.mubr.msk.f32.mxu0 (!%p389_p2), %vm1485_vm0, %v1484_v2  ;;  %v522_v3 = vld [vmem:[%s1899_s3] sm:$0xff] (!%p389_p2)  ;;  %v1486_v6 = vmov (!%p389_p2), 0.0|0.0   ;;  %v525_v8 = vld [vmem:[%s1899_s3 + $0x18] sm:$0xff] (!%p389_p2)  ;;  %vm447_vm1 = vcmask (!%p389_p2), 64512   ;;  %v527_v11 = vld [vmem:[%s1899_s3 + $0x28] sm:$0xff] (!%p389_p2) }
   0x9   : > { %1154 = vmatpush3.msra.mxu0 (!%p389_p2), %v439_v1  ;;  %1333 = vmatprep.subr.bf16.mxu1 (!%p389_p2), %v1486_v6  ;;  %v1334_v7 = vpack.c.bf16 (!%p389_p2), %v523_v4, %v522_v3  ;;  %v1337_v9 = vpack.c.bf16 (!%p389_p2), %v525_v8, %v524_v5  ;;  %v526_v10 = vld [vmem:[%s1899_s3 + $0x20] sm:$0xff] (!%p389_p2)  ;;  %v528_v14 = vld [vmem:[%s1899_s3 + $0x30] sm:$0xff] (!%p389_p2)  ;;  %v529_v15 = vld [vmem:[%s1899_s3 + $0x38] sm:$0xff] (!%p389_p2)  ;;  %vm995_vm2 = vcmask (!%p389_p2), 31744  }
   0xa   : > { %1190 = vmatprep.mubr.msk.f32.mxu1 (!%p389_p2), %vm1485_vm0, %v1484_v2  ;;  %1357 = vmatprep.subr.bf16.mxu0 (!%p389_p2), %v1486_v6  ;;  %v1340_v13 = vpack.c.bf16 (!%p389_p2), %v527_v11, %v526_v10  ;;  %v1343_v16 = vpack.c.bf16 (!%p389_p2), %v529_v15, %v528_v14  ;;  %v530_v17 = vld [vmem:[%s1899_s3 + $0x40] sm:$0xff] (!%p389_p2)  ;;  %v531_v18 = vld [vmem:[%s1899_s3 + $0x48] sm:$0xff] (!%p389_p2)  ;;  %v532_v20 = vld [vmem:[%s1899_s3 + $0x50] sm:$0xff] (!%p389_p2) }
   0xb   : > { %1335 = vmatpush3.bf16.msra.mxu1 (!%p389_p2), %v1334_v7  ;;  %v1346_v19 = vpack.c.bf16 (!%p389_p2), %v531_v18, %v530_v17  ;;  %v533_v21 = vld [vmem:[%s1899_s3 + $0x58] sm:$0xff] (!%p389_p2)  ;;  %v534_v23 = vld [vmem:[%s1899_s3 + $0x60] sm:$0xff] (!%p389_p2)  ;;  %v535_v24 = vld [vmem:[%s1899_s3 + $0x68] sm:$0xff] (!%p389_p2) }
   0xc   : > { %1336 = vmatprep.subr.bf16.mxu1 (!%p389_p2), %v1486_v6  ;;  %v1349_v22 = vpack.c.bf16 (!%p389_p2), %v533_v21, %v532_v20  ;;  %v1352_v25 = vpack.c.bf16 (!%p389_p2), %v535_v24, %v534_v23  ;;  %v536_v26 = vld [vmem:[%s1899_s3 + $0x70] sm:$0xff] (!%p389_p2)  ;;  %v537_v27 = vld [vmem:[%s1899_s3 + $0x78] sm:$0xff] (!%p389_p2)  ;;  %v616_v29 = vld [vmem:[%s1901_s5] sm:$0xff] (!%p389_p2) }
   0xd   : > { %v1355_v28 = vpack.c.bf16 (!%p389_p2), %v537_v27, %v536_v26  ;;  %v617_v30 = vld [vmem:[%s1901_s5 + $0x8] sm:$0xff] (!%p389_p2)  ;;  %v618_v31 = vld [vmem:[%s1901_s5 + $0x10] sm:$0xff] (!%p389_p2)  ;;  %v619_v33 = vld [vmem:[%s1901_s5 + $0x18] sm:$0xff] (!%p389_p2) }
   0xe   : > { %v1358_v32 = vpack.c.bf16 (!%p389_p2), %v617_v30, %v616_v29  ;;  %v1361_v34 = vpack.c.bf16 (!%p389_p2), %v619_v33, %v618_v31  ;;  %v620_v35 = vld [vmem:[%s1901_s5 + $0x20] sm:$0xff] (!%p389_p2)  ;;  %v621_v36 = vld [vmem:[%s1901_s5 + $0x28] sm:$0xff] (!%p389_p2)  ;;  %v622_v38 = vld [vmem:[%s1901_s5 + $0x30] sm:$0xff] (!%p389_p2) }
   0xf   : > { %s1911_s28 = smov (!%p430_p3, %s1050_s28), 1  ;;  %1338 = vmatpush3.bf16.msra.mxu1 %v1337_v9  ;;  %v1364_v37 = vpack.c.bf16 %v621_v36, %v620_v35  ;;  %v623_v39 = vld [vmem:[%s1901_s5 + $0x38] sm:$0xff]  ;;  %v624_v41 = vld [vmem:[%s1901_s5 + $0x40] sm:$0xff]  ;;  %v625_v42 = vld [vmem:[%s1901_s5 + $0x48] sm:$0xff] }
  0x10   : > { %s1055_s21 = sshll.u32 %s1911_s28, 3  ;;  %1339 = vmatprep.subr.bf16.mxu1 %v1486_v6  ;;  %v1367_v40 = vpack.c.bf16 %v623_v39, %v622_v38  ;;  %v1370_v43 = vpack.c.bf16 %v625_v42, %v624_v41  ;;  %v1057_v44 = vld [vmem:[%s1898_s2] ss:$0 sm:$0xff]  ;;  %v626_v49 = vld [vmem:[%s1901_s5 + $0x50] sm:$0xff]  ;;  %v627_v50 = vld [vmem:[%s1901_s5 + $0x58] sm:$0xff] }
  0x11   : > { %s433_s24 = scalar_lea.vmem %s1896_s0, %s1055_s21  ;;  %v1373_v51 = vpack.c.bf16 %v627_v50, %v626_v49  ;;  %v628_v52 = vld [vmem:[%s1901_s5 + $0x60] sm:$0xff]  ;;  %v629_v53 = vld [vmem:[%s1901_s5 + $0x68] sm:$0xff]  ;;  %v630_v55 = vld [vmem:[%s1901_s5 + $0x70] sm:$0xff] }
  0x12   : > { %v438_v12 = vld [vmem:[%s433_s24] sm:$0xff]  ;;  %v1376_v54 = vpack.c.bf16 %v629_v53, %v628_v52  ;;  %v631_v56 = vld [vmem:[%s1901_s5 + $0x78] sm:$0xff]  ;;  %v711_v59 = vld [vmem:[%s1903_s7 + $0x8] sm:$0xff]  ;;  %s437_s24 = scalar_lea.vmem %s1909_s13, %s1055_s21 }
  0x13   : > { %1156 = vmatmul.mubr.msk.f32.vlgmr.msra.gmra.mrb[0].mxu0 %vm447_vm1, %v438_v12  ;;  %1341 = vmatpush3.bf16.msra.mxu1 %v1340_v13  ;;  %v1379_v57 = vpack.c.bf16 %v631_v56, %v630_v55  ;;  %v710_v58 = vld [vmem:[%s1903_s7] sm:$0xff]  ;;  %v712_v60 = vld [vmem:[%s1903_s7 + $0x10] sm:$0xff]  ;;  %v713_v62 = vld [vmem:[%s1903_s7 + $0x18] sm:$0xff] }
  0x14   : > { %1225 = vmatprep.mubr.msk.f32.mxu0 %vm1485_vm0, %v1484_v2  ;;  %1342 = vmatprep.subr.bf16.mxu1 %v1486_v6  ;;  %v1382_v61 = vpack.c.bf16 %v711_v59, %v710_v58  ;;  %v1385_v63 = vpack.c.bf16 %v713_v62, %v712_v60  ;;  %v714_v0 = vld [vmem:[%s1903_s7 + $0x20] sm:$0xff]  ;;  %v715_v1 = vld [vmem:[%s1903_s7 + $0x28] sm:$0xff]  ;;  %v716_v4 = vld [vmem:[%s1903_s7 + $0x30] sm:$0xff] }
  0x15   : > { %1359 = vmatpush3.bf16.msra.mxu0 %v1358_v32  ;;  %v1388_v3 = vpack.c.bf16 %v715_v1, %v714_v0  ;;  %v717_v5 = vld [vmem:[%s1903_s7 + $0x38] sm:$0xff]  ;;  %v718_v8 = vld [vmem:[%s1903_s7 + $0x40] sm:$0xff]  ;;  %v719_v9 = vld [vmem:[%s1903_s7 + $0x48] sm:$0xff] }
  0x16   : > { %1360 = vmatprep.subr.bf16.mxu0 %v1486_v6  ;;  %v1391_v7 = vpack.c.bf16 %v717_v5, %v716_v4  ;;  %v1394_v10 = vpack.c.bf16 %v719_v9, %v718_v8  ;;  %v1059_v11 = vld [vmem:[%s1900_s4] ss:$0 sm:$0xff]  ;;  %v721_v17 = vld [vmem:[%s1903_s7 + $0x58] sm:$0xff]  ;;  %v723_v20 = vld [vmem:[%s1903_s7 + $0x68] sm:$0xff] }
  0x17   : > { %1344 = vmatpush3.bf16.msra.mxu1 %v1343_v16  ;;  %v720_v16 = vld [vmem:[%s1903_s7 + $0x50] sm:$0xff]  ;;  %v725_v23 = vld [vmem:[%s1903_s7 + $0x78] sm:$0xff]  ;;  %v805_v26 = vld [vmem:[%s1905_s9 + $0x8] sm:$0xff] }
  0x18   : > { %1345 = vmatprep.subr.bf16.mxu1 %v1486_v6  ;;  %v1397_v18 = vpack.c.bf16 %v721_v17, %v720_v16  ;;  %v806_v27 = vld [vmem:[%s1905_s9 + $0x10] sm:$0xff]  ;;  %v807_v29 = vld [vmem:[%s1905_s9 + $0x18] sm:$0xff]  ;;  %v808_v31 = vld [vmem:[%s1905_s9 + $0x20] sm:$0xff] }
  0x19   : > { %1362 = vmatpush3.bf16.msra.mxu0 %v1361_v34  ;;  %v1409_v30 = vpack.c.bf16 %v807_v29, %v806_v27  ;;  %v809_v32 = vld [vmem:[%s1905_s9 + $0x28] sm:$0xff]  ;;  %v810_v34 = vld [vmem:[%s1905_s9 + $0x30] sm:$0xff]  ;;  %v811_v35 = vld [vmem:[%s1905_s9 + $0x38] sm:$0xff] }
  0x1a   : > { %1363 = vmatprep.subr.bf16.mxu0 %v1486_v6  ;;  %v1412_v33 = vpack.c.bf16 %v809_v32, %v808_v31  ;;  %v1415_v36 = vpack.c.bf16 %v811_v35, %v810_v34  ;;  %v813_v38 = vld [vmem:[%s1905_s9 + $0x48] sm:$0xff]  ;;  %v818_v50 = vld [vmem:[%s1905_s9 + $0x70] sm:$0xff]  ;;  %v898_v53 = vld [vmem:[%s1907_s11] sm:$0xff] }
  0x1b   : > { %1347 = vmatpush3.bf16.msra.mxu1 %v1346_v19  ;;  %v722_v19 = vld [vmem:[%s1903_s7 + $0x60] sm:$0xff]  ;;  %v817_v49 = vld [vmem:[%s1905_s9 + $0x68] sm:$0xff]  ;;  %v900_v55 = vld [vmem:[%s1907_s11 + $0x10] sm:$0xff] }
  0x1c   : > { %1348 = vmatprep.subr.bf16.mxu1 %v1486_v6  ;;  %v1400_v21 = vpack.c.bf16 %v723_v20, %v722_v19  ;;  %v902_v59 = vld [vmem:[%s1907_s11 + $0x20] sm:$0xff]  ;;  %v903_v60 = vld [vmem:[%s1907_s11 + $0x28] sm:$0xff]  ;;  %v904_v62 = vld [vmem:[%s1907_s11 + $0x30] sm:$0xff] }
  0x1d   : > { %1365 = vmatpush3.bf16.msra.mxu0 %v1364_v37  ;;  %v812_v37 = vld [vmem:[%s1905_s9 + $0x40] sm:$0xff]  ;;  %v912_v17 = vld [vmem:[%s1907_s11 + $0x70] sm:$0xff] }
  0x1e   : > { %1366 = vmatprep.subr.bf16.mxu0 %v1486_v6  ;;  %v1418_v39 = vpack.c.bf16 %v813_v38, %v812_v37  ;;  %v906_v1 = vld [vmem:[%s1907_s11 + $0x40] sm:$0xff] }
  0x1f   : > { %1350 = vmatpush3.bf16.msra.mxu1 %v1349_v22  ;;  %v724_v22 = vld [vmem:[%s1903_s7 + $0x70] sm:$0xff]  ;;  %v1061_v5 = vld [vmem:[%s1904_s8] ss:$0 sm:$0xff] }
  0x20   : > { %1351 = vmatprep.subr.bf16.mxu1 %v1486_v6  ;;  %v1403_v24 = vpack.c.bf16 %v725_v23, %v724_v22  ;;  %v1063_v20 = vld [vmem:[#allocation2] ss:$0 sm:$0xff] }
  0x21   : > { %1368 = vmatpush3.bf16.msra.mxu0 %v1367_v40  ;;  %v1060_v40 = vld [vmem:[%s1902_s6] ss:$0 sm:$0xff] }
  0x22   : > { %1369 = vmatprep.subr.bf16.mxu0 %v1486_v6  ;;  %v1062_v22 = vld [vmem:[%s1906_s10] ss:$0 sm:$0xff] }
  0x23   : > { %1353 = vmatpush3.bf16.msra.mxu1 %v1352_v25  ;;  %v804_v25 = vld [vmem:[%s1905_s9] sm:$0xff] }
  0x24   : > { %1354 = vmatprep.subr.bf16.mxu1 %v1486_v6 }
  0x25   : > { %1371 = vmatpush3.bf16.msra.mxu0 %v1370_v43 }
  0x26   : > { %1372 = vmatprep.subr.bf16.mxu0 %v1486_v6 }
  0x27   : > { %1356 = vmatpush3.bf16.msra.mxu1 %v1355_v28  ;;  %v1406_v28 = vpack.c.bf16 %v805_v26, %v804_v25 }
  0x28   : > { %1381 = vmatprep.subr.bf16.mxu1 %v1486_v6 }
  0x29   : > { %1374 = vmatpush3.bf16.msra.mxu0 %v1373_v51  ;;  %v819_v51 = vld [vmem:[%s1905_s9 + $0x78] sm:$0xff] }
  0x2a   : > { %1375 = vmatprep.subr.bf16.mxu0 %v1486_v6  ;;  %v1427_v52 = vpack.c.bf16 %v819_v51, %v818_v50 }
  0x2d   : > { %1377 = vmatpush3.bf16.msra.mxu0 %v1376_v54  ;;  %v899_v54 = vld [vmem:[%s1907_s11 + $0x8] sm:$0xff] }
  0x2e   : > { %1378 = vmatprep.subr.bf16.mxu0 %v1486_v6  ;;  %v1430_v56 = vpack.c.bf16 %v899_v54, %v898_v53 }
  0x31   : > { %1380 = vmatpush3.bf16.msra.mxu0 %v1379_v57  ;;  %v901_v57 = vld [vmem:[%s1907_s11 + $0x18] sm:$0xff] }
  0x32   : > { %1405 = vmatprep.subr.bf16.mxu0 %v1486_v6  ;;  %v1433_v58 = vpack.c.bf16 %v901_v57, %v900_v55 }
  0xe6   : > { %v517_v45 = vpop.f32.mrb[0].mxu0 }
  0xe7   : > { %v518_v46 = vadd.f32 %v1057_v44, %v517_v45  ;;  %v1157_v47 = vpop.f32.mrb[1].mxu0  ;;  %v814_v45 = vld [vmem:[%s1905_s9 + $0x50] sm:$0xff] }
  0xe9   : > { %1466 = vtanh.f32 %v518_v46  ;;  %v815_v46 = vld [vmem:[%s1905_s9 + $0x58] sm:$0xff] }
  0xea   : > { %v1421_v47 = vpack.c.bf16 %v815_v46, %v814_v45 }
  0xf3   : > { %v1467_v48 = vpop.eup %1466 }
  0xf4   : > { %1191 = vmatmul.mubr.f32.vlgmr.msra.gmra.mrb[0].mxu1 %v1467_v48  ;;  %v816_v48 = vld [vmem:[%s1905_s9 + $0x60] sm:$0xff] }
  0xf5   : > { %1260 = vmatprep.mubr.msk.f32.mxu1 %vm1485_vm0, %v1484_v2  ;;  %1383 = vmatpush3.bf16.msra.mxu1 %v1382_v61  ;;  %v1436_v61 = vpack.c.bf16 %v903_v60, %v902_v59 }
  0xf6   : > { %1384 = vmatprep.subr.bf16.mxu1 %v1486_v6 }
  0xf9   : > { %1386 = vmatpush3.bf16.msra.mxu1 %v1385_v63  ;;  %v905_v63 = vld [vmem:[%s1907_s11 + $0x38] sm:$0xff] }
  0xfa   : > { %1387 = vmatprep.subr.bf16.mxu1 %v1486_v6  ;;  %v1439_v0 = vpack.c.bf16 %v905_v63, %v904_v62 }
  0xfd   : > { %1389 = vmatpush3.bf16.msra.mxu1 %v1388_v3  ;;  %v907_v3 = vld [vmem:[%s1907_s11 + $0x48] sm:$0xff] }
  0xfe   : > { %1390 = vmatprep.subr.bf16.mxu1 %v1486_v6  ;;  %v1442_v4 = vpack.c.bf16 %v907_v3, %v906_v1 }
 0x101   : > { %1392 = vmatpush3.bf16.msra.mxu1 %v1391_v7 }
 0x102   : > { %1393 = vmatprep.subr.bf16.mxu1 %v1486_v6 }
 0x105   : > { %1395 = vmatpush3.bf16.msra.mxu1 %v1394_v10 }
 0x106   : > { %1396 = vmatprep.subr.bf16.mxu1 %v1486_v6 }
 0x109   : > { %1398 = vmatpush3.bf16.msra.mxu1 %v1397_v18  ;;  %v913_v18 = vld [vmem:[%s1907_s11 + $0x78] sm:$0xff] }
 0x10a   : > { %1399 = vmatprep.subr.bf16.mxu1 %v1486_v6  ;;  %v1451_v19 = vpack.c.bf16 %v913_v18, %v912_v17 }
 0x10d   : > { %1401 = vmatpush3.bf16.msra.mxu1 %v1400_v21  ;;  %v1487_v21 = vmov 0  }
 0x10e   : > { %1402 = vmatprep.subr.bf16.mxu1 %v1486_v6  ;;  %1465 = vset.pattern.permute.xlu0 %v1487_v21 }
 0x10f   : > { %991 = vperm.xlu0 %1465, %v1063_v20  }
 0x111   : > { %1404 = vmatpush3.bf16.msra.mxu1 %v1403_v24 }
 0x112   : > { %1429 = vmatprep.subr.bf16.mxu1 %v1486_v6 }
 0x18e   : > { %v992_v27 = vpop.permute.xlu0 %991 }
 0x1c7   : > { %v611_v12 = vpop.f32.mrb[0].mxu1 }
 0x1c8   : > { %v612_v13 = vadd.f32 %v1059_v11, %v611_v12  ;;  %v1192_v14 = vpop.f32.mrb[1].mxu1  ;;  %v908_v11 = vld [vmem:[%s1907_s11 + $0x50] sm:$0xff]  ;;  %v909_v12 = vld [vmem:[%s1907_s11 + $0x58] sm:$0xff] }
 0x1c9   : > { %v910_v14 = vld [vmem:[%s1907_s11 + $0x60] sm:$0xff] }
 0x1ca   : > { %1468 = vtanh.f32 %v612_v13  ;;  %v1445_v13 = vpack.c.bf16 %v909_v12, %v908_v11 }
 0x1d4   : > { %v1469_v15 = vpop.eup %1468 }
 0x1d5   : > { %1226 = vmatmul.mubr.f32.vlgmr.msra.gmra.mrb[2].mxu0 %v1469_v15  ;;  %v911_v15 = vld [vmem:[%s1907_s11 + $0x68] sm:$0xff] }
 0x1d6   : > { %1295 = vmatprep.mubr.msk.f32.mxu0 %vm1485_vm0, %v1484_v2  ;;  %1407 = vmatpush3.bf16.msra.mxu0 %v1406_v28  ;;  %v1448_v16 = vpack.c.bf16 %v911_v15, %v910_v14 }
 0x1d7   : > { %1408 = vmatprep.subr.bf16.mxu0 %v1486_v6 }
 0x1da   : > { %1410 = vmatpush3.bf16.msra.mxu0 %v1409_v30 }
 0x1db   : > { %1411 = vmatprep.subr.bf16.mxu0 %v1486_v6 }
 0x1de   : > { %1413 = vmatpush3.bf16.msra.mxu0 %v1412_v33 }
 0x1df   : > { %1414 = vmatprep.subr.bf16.mxu0 %v1486_v6 }
 0x1e2   : > { %1416 = vmatpush3.bf16.msra.mxu0 %v1415_v36 }
 0x1e3   : > { %1417 = vmatprep.subr.bf16.mxu0 %v1486_v6 }
 0x1e6   : > { %1419 = vmatpush3.bf16.msra.mxu0 %v1418_v39 }
 0x1e7   : > { %1420 = vmatprep.subr.bf16.mxu0 %v1486_v6 }
 0x1ea   : > { %1422 = vmatpush3.bf16.msra.mxu0 %v1421_v47 }
 0x1eb   : > { %1423 = vmatprep.subr.bf16.mxu0 %v1486_v6 }
 0x2a8   : > { %v705_v41 = vpop.f32.mrb[2].mxu0 }
 0x2a9   : > { %v706_v42 = vadd.f32 %v1060_v40, %v705_v41  ;;  %v1227_v43 = vpop.f32.mrb[3].mxu0 }
 0x2ab   : > { %1470 = vtanh.f32 %v706_v42 }
 0x2b5   : > { %v1471_v44 = vpop.eup %1470 }
 0x2b6   : > { %1261 = vmatmul.mubr.f32.vlgmr.msra.gmra.mrb[2].mxu1 %v1471_v44 }
 0x2b7   : > { %1330 = vmatprep.mubr.msk.f32.mxu1 %vm1485_vm0, %v1484_v2  ;;  %v1424_v2 = vpack.c.bf16 %v817_v49, %v816_v48  ;;  %1431 = vmatpush3.bf16.msra.mxu1 %v1430_v56 }
 0x2b8   : > { %1432 = vmatprep.subr.bf16.mxu1 %v1486_v6 }
 0x2b9   : > { %1425 = vmatpush3.bf16.msra.mxu0 %v1424_v2 }
 0x2ba   : > { %1426 = vmatprep.subr.bf16.mxu0 %v1486_v6 }
 0x2bb   : > { %1434 = vmatpush3.bf16.msra.mxu1 %v1433_v58 }
 0x2bc   : > { %1435 = vmatprep.subr.bf16.mxu1 %v1486_v6 }
 0x2bd   : > { %1428 = vmatpush3.bf16.msra.mxu0 %v1427_v52 }
 0x2bf   : > { %1437 = vmatpush3.bf16.msra.mxu1 %v1436_v61 }
 0x2c0   : > { %1438 = vmatprep.subr.bf16.mxu1 %v1486_v6 }
 0x2c3   : > { %1440 = vmatpush3.bf16.msra.mxu1 %v1439_v0 }
 0x2c4   : > { %1441 = vmatprep.subr.bf16.mxu1 %v1486_v6 }
 0x2c7   : > { %1443 = vmatpush3.bf16.msra.mxu1 %v1442_v4 }
 0x2c8   : > { %1444 = vmatprep.subr.bf16.mxu1 %v1486_v6 }
 0x2cb   : > { %1446 = vmatpush3.bf16.msra.mxu1 %v1445_v13 }
 0x2cc   : > { %1447 = vmatprep.subr.bf16.mxu1 %v1486_v6 }
 0x2cf   : > { %1449 = vmatpush3.bf16.msra.mxu1 %v1448_v16 }
 0x2d0   : > { %1450 = vmatprep.subr.bf16.mxu1 %v1486_v6 }
 0x2d3   : > { %1452 = vmatpush3.bf16.msra.mxu1 %v1451_v19 }
 0x389   : > { %v799_v7 = vpop.f32.mrb[2].mxu1 }
 0x38a   : > { %v800_v8 = vadd.f32 %v1061_v5, %v799_v7  ;;  %v1262_v9 = vpop.f32.mrb[3].mxu1 }
 0x38c   : > { %1472 = vtanh.f32 %v800_v8 }
 0x396   : > { %v1473_v10 = vpop.eup %1472 }
 0x397   : > { %1296 = vmatmul.mubr.f32.vlgmr.msra.gmra.mrb[4].mxu0 %v1473_v10 }
 0x46a   : > { %v893_v23 = vpop.f32.mrb[4].mxu0 }
 0x46b   : > { %v894_v24 = vadd.f32 %v1062_v22, %v893_v23  ;;  %v1297_v25 = vpop.f32.mrb[5].mxu0 }
 0x46d   : > { %1474 = vtanh.f32 %v894_v24 }
 0x477   : > { %v1475_v26 = vpop.eup %1474 }
 0x478   : > { %1331 = vmatmul.mubr.f32.vlgmr.msra.gmra.mrb[4].mxu1 %v1475_v26 }
 0x54b   : > { %v980_v6 = vpop.f32.mrb[4].mxu1 }
 0x54c   : > { %v994_v28 = vadd.f32 %v992_v27, %v980_v6  ;;  %v1332_v29 = vpop.f32.mrb[5].mxu1 }
 0x54e   : > { %996 = vst.msk [vmem:[%s437_s24] sm:$0xff] %vm995_vm2, %v994_v28 }
 0x54f PF: > { %s25_s27 = sadd.s32 1, %s1482_s27  }
 0x550   : > { %p22_p4 = scmp.ge.s32.totalorder %s25_s27, 4  }
 0x552   :  { %24 = sbr.rel (!%p22_p4) target bundleno = 3 (0x3), region = 102 }

</bundles_post_ra>
